<compile_context>
chip_gen: v6e
topology: v6e:2x2x1
jax: 0.10.0
libtpu: 0.0.40
codegen_flags: <defaults>
</compile_context>

<pallas_src>
import numpy as np
import jax
import jax.numpy as jnp
from jax.experimental import pallas as pl
from jax.experimental.pallas import tpu as pltpu

TWO_PI = 2.0 * np.pi
HALF_PI = 0.5 * np.pi


def ffn_filter_kernel(x_ref, bcat_ref, wt_ref, phase_ref, b_ref, z_ref, o_ref):
    x = x_ref[...]          # (TN, Cin)  f32
    bcat = bcat_ref[...]    # (Cin, Cm)  f32  = 2*pi * [B | B]   (resident)
    wt = wt_ref[...]        # (Cm, Cm)   f32  = W.T              (resident)
    phase = phase_ref[...]  # (1, Cm)    f32  = [0,...,0, pi/2,...,pi/2]
    b = b_ref[...]          # (1, Cm)    f32
    z = z_ref[...]          # (TN, Cm)   f32

    # Fused Fourier-feature projection: one lane-dense MXU matmul.  The 2*pi
    # scale and the [B | B] duplication live in bcat (parameter-only prep).
    proj = jnp.dot(x, bcat, preferred_element_type=jnp.float32)      # (TN, Cm)

    # concat([sin(p), cos(p)], -1) via a single sin: columns of bcat are
    # duplicated, so lanes [0, Cm/2) get phase 0 (sin) and lanes [Cm/2, Cm)
    # get phase pi/2 (cos).  One trig evaluation over the tile, no select.
    emb = jnp.sin(proj + phase)                                      # (TN, Cm)

    # Linear (weight pre-transposed) + bias + residual + ReLU, fused store.
    lin = jnp.dot(emb, wt, preferred_element_type=jnp.float32) + b   # (TN, Cm)
    o_ref[...] = jnp.maximum(z + lin, 0.0).astype(o_ref.dtype)


def _round_up(n, m):
    return ((n + m - 1) // m) * m


def ffn_filter(x, z, B, weight, bias, *, tn_max=2048):
    """FFNFilter forward.  x: (..., N, Cin), z: (..., N, Cm) -> (..., N, Cm).

    B: (Cin, Cm//2) Gaussian Fourier matrix (fixed), weight: (Cm, Cm) PyTorch
    Linear weight, bias: (Cm,).  Cm must be even (Cm a multiple of 128 keeps
    every store lane-dense / unmasked).
    """
    *lead, N, Cin = x.shape
    Cm = weight.shape[0]
    assert Cm % 2 == 0, "interm_channels must be even (sin/cos halves)"
    half = Cm // 2

    x2 = x.reshape(-1, Cin)     # rows map to sublanes
    z2 = z.reshape(-1, Cm)      # Cm maps to lanes (lane-dense loads/stores)
    rows = x2.shape[0]

    # ---- Parameter-only preprocessing (hoist / jit once per param update) ----
    bcat = TWO_PI * jnp.concatenate([B, B], axis=1)          # (Cin, Cm)
    wt = weight.T.astype(jnp.float32)                        # (Cm, Cm)
    b2 = bias.reshape(1, Cm).astype(jnp.float32)             # (1, Cm)
    phase = jnp.concatenate(
        [jnp.zeros((1, half), jnp.float32),
         jnp.full((1, half), HALF_PI, jnp.float32)], axis=1)  # (1, Cm)

    # Row tile: multiple of 8, capped at tn_max (<=2048 keeps double-buffered
    # x/z/out tiles + resident params well under v7x's scoped VMEM).
    TN = min(tn_max, _round_up(rows, 8))
    TN = _round_up(TN, 8)
    grid = (pl.cdiv(rows, TN),)

    cost = pl.CostEstimate(
        flops=2 * rows * Cin * Cm + 2 * rows * Cm * Cm + 3 * rows * Cm,
        transcendentals=rows * Cm,                     # single sin per element
        bytes_accessed=4 * (x2.size + bcat.size + wt.size + b2.size
                            + phase.size + 2 * z2.size),
    )

    out = pl.pallas_call(
        ffn_filter_kernel,
        out_shape=jax.ShapeDtypeStruct((rows, Cm), jnp.float32),
        grid=grid,
        in_specs=[
            pl.BlockSpec((TN, Cin), lambda i: (i, 0)),   # x: streamed per tile
            pl.BlockSpec((Cin, Cm), lambda i: (0, 0)),   # bcat: resident
            pl.BlockSpec((Cm, Cm), lambda i: (0, 0)),    # W.T: resident
            pl.BlockSpec((1, Cm), lambda i: (0, 0)),     # phase: resident
            pl.BlockSpec((1, Cm), lambda i: (0, 0)),     # bias: resident
            pl.BlockSpec((TN, Cm), lambda i: (i, 0)),    # z: streamed per tile
        ],
        out_specs=pl.BlockSpec((TN, Cm), lambda i: (i, 0)),
        compiler_params=pltpu.CompilerParams(
            dimension_semantics=("parallel",)),          # megacore on v7x
        cost_estimate=cost,
    )(x2, bcat, wt, phase, b2, z2)
    return out.reshape(*lead, N, Cm)


def ffn_filter_ref(x, z, B, weight, bias):
    """Pure-JAX reference mirroring the PyTorch forward."""
    proj = (TWO_PI * x) @ B                                          # (..., N, Cm//2)
    emb = jnp.concatenate([jnp.sin(proj), jnp.cos(proj)], axis=-1)   # (..., N, Cm)
    lin = jnp.einsum("...nm,km->...nk", emb, weight) + bias
    return jnp.maximum(z + lin, 0.0)


if __name__ == "__main__":
    in_channels = 16
    interm_channels = 128
    batch = 2
    N = 24
    scale = 1.0   # embedder scale; moderate so trig arguments stay well-conditioned

    key = jax.random.PRNGKey(0)
    k_B, k_w, k_b, k_x, k_z = jax.random.split(key, 5)

    mapping = interm_channels // 2
    # GaussianFFNEmbedder: B ~ N(0, scale^2), fixed (not trained).
    B = jax.random.normal(k_B, (in_channels, mapping), jnp.float32) * scale
    # nn.Linear(embedder.out_channels=interm_channels, interm_channels) default init.
    bound = 1.0 / np.sqrt(interm_channels)
    weight = jax.random.uniform(k_w, (interm_channels, interm_channels),
                                jnp.float32, -bound, bound)
    bias = jax.random.uniform(k_b, (interm_channels,), jnp.float32, -bound, bound)

    x = jax.random.normal(k_x, (batch, N, in_channels), jnp.float32)
    z = jax.random.normal(k_z, (batch, N, interm_channels), jnp.float32)

    # Small tn_max here forces a 3-step grid (48 rows / 16-row tiles) so the
    # streamed / resident BlockSpec split is actually exercised at demo size.
    out = jax.block_until_ready(ffn_filter(x, z, B, weight, bias, tn_max=16))
    ref = ffn_filter_ref(x, z, B, weight, bias)
    # Tolerance absorbs sin-vs-cos (phase trick), 2*pi-folding order, and
    # MXU-pass differences between the Mosaic kernel and the XLA reference.
    np.testing.assert_allclose(np.asarray(out), np.asarray(ref),
                               rtol=1e-3, atol=1e-3)
    print("KERNEL_OK")
</pallas_src>

<mosaic_0001>
module attributes {stable_mosaic.version = 11 : i64} {
  func.func @ffn_filter_kernel(%arg0: i32, %arg1: memref<16x16xf32, #tpu.memory_space<vmem>>, %arg2: memref<16x128xf32, #tpu.memory_space<vmem>>, %arg3: memref<128x128xf32, #tpu.memory_space<vmem>>, %arg4: memref<1x128xf32, #tpu.memory_space<vmem>>, %arg5: memref<1x128xf32, #tpu.memory_space<vmem>>, %arg6: memref<16x128xf32, #tpu.memory_space<vmem>>, %arg7: memref<16x128xf32, #tpu.memory_space<vmem>>) attributes {dimension_semantics = [#tpu.dimension_semantics<parallel>], iteration_bounds = array<i64: 3>, scalar_prefetch = 0 : i64, scratch_operands = 0 : i64, tpu.core_type = #tpu.core_type<tc>, window_params = [{transform_indices = @transform_0, window_bounds = array<i64: 16, 16>}, {pipeline_mode = #tpu.pipeline_mode<synchronous>, transform_indices = @transform_1, window_bounds = array<i64: 16, 128>}, {pipeline_mode = #tpu.pipeline_mode<synchronous>, transform_indices = @transform_2, window_bounds = array<i64: 128, 128>}, {pipeline_mode = #tpu.pipeline_mode<synchronous>, transform_indices = @transform_3, window_bounds = array<i64: 1, 128>}, {pipeline_mode = #tpu.pipeline_mode<synchronous>, transform_indices = @transform_4, window_bounds = array<i64: 1, 128>}, {transform_indices = @transform_5, window_bounds = array<i64: 16, 128>}, {transform_indices = @transform_6, window_bounds = array<i64: 16, 128>}]} {
    %c0 = arith.constant 0 : index
    %c0_0 = arith.constant 0 : index
    %0 = vector.load %arg1[%c0, %c0_0] : memref<16x16xf32, #tpu.memory_space<vmem>>, vector<16x16xf32>
    %c0_1 = arith.constant 0 : index
    %c0_2 = arith.constant 0 : index
    %1 = vector.load %arg2[%c0_1, %c0_2] : memref<16x128xf32, #tpu.memory_space<vmem>>, vector<16x128xf32>
    %c0_3 = arith.constant 0 : index
    %c0_4 = arith.constant 0 : index
    %2 = vector.load %arg3[%c0_3, %c0_4] : memref<128x128xf32, #tpu.memory_space<vmem>>, vector<128x128xf32>
    %c0_5 = arith.constant 0 : index
    %c0_6 = arith.constant 0 : index
    %3 = vector.load %arg4[%c0_5, %c0_6] : memref<1x128xf32, #tpu.memory_space<vmem>>, vector<1x128xf32>
    %c0_7 = arith.constant 0 : index
    %c0_8 = arith.constant 0 : index
    %4 = vector.load %arg5[%c0_7, %c0_8] : memref<1x128xf32, #tpu.memory_space<vmem>>, vector<1x128xf32>
    %c0_9 = arith.constant 0 : index
    %c0_10 = arith.constant 0 : index
    %5 = vector.load %arg6[%c0_9, %c0_10] : memref<16x128xf32, #tpu.memory_space<vmem>>, vector<16x128xf32>
    %cst = arith.constant dense<0.000000e+00> : vector<16x128xf32>
    %6 = tpu.matmul %0, %1, %cst {dimension_numbers = #tpu.dot_dimension_numbers<[1], [0], [0], [1], [0, 0, 1, 1], [], []>} : vector<16x16xf32>, vector<16x128xf32>, vector<16x128xf32> -> vector<16x128xf32>
    %7 = vector.broadcast %3 : vector<1x128xf32> to vector<16x128xf32>
    %8 = arith.addf %6, %7 : vector<16x128xf32>
    %9 = math.sin %8 : vector<16x128xf32>
    %cst_11 = arith.constant dense<0.000000e+00> : vector<16x128xf32>
    %10 = tpu.matmul %9, %2, %cst_11 {dimension_numbers = #tpu.dot_dimension_numbers<[1], [0], [0], [1], [0, 0, 1, 1], [], []>} : vector<16x128xf32>, vector<128x128xf32>, vector<16x128xf32> -> vector<16x128xf32>
    %11 = vector.broadcast %4 : vector<1x128xf32> to vector<16x128xf32>
    %12 = arith.addf %10, %11 : vector<16x128xf32>
    %13 = arith.addf %5, %12 : vector<16x128xf32>
    %cst_12 = arith.constant 0.000000e+00 : f32
    %14 = vector.broadcast %cst_12 : f32 to vector<16x128xf32>
    %15 = arith.maximumf %13, %14 : vector<16x128xf32>
    %c0_13 = arith.constant 0 : index
    %c0_14 = arith.constant 0 : index
    %16 = vector.load %arg7[%c0_13, %c0_14] : memref<16x128xf32, #tpu.memory_space<vmem>>, vector<16x128xf32>
    tpu.vector_store %arg7[%c0_13, %c0_14], %15 {strides = array<i32>} : memref<16x128xf32, #tpu.memory_space<vmem>>, vector<16x128xf32>,
    return
  }
  func.func @transform_0(%arg0: i32) -> (i32, i32) {
    %c0_i32 = arith.constant 0 : i32
    %c0_i32_0 = arith.constant 0 : i32
    return %arg0, %c0_i32 : i32, i32
  }
  func.func @transform_1(%arg0: i32) -> (i32, i32) {
    %c0_i32 = arith.constant 0 : i32
    %c0_i32_0 = arith.constant 0 : i32
    %c0_i32_1 = arith.constant 0 : i32
    return %c0_i32, %c0_i32_0 : i32, i32
  }
  func.func @transform_2(%arg0: i32) -> (i32, i32) {
    %c0_i32 = arith.constant 0 : i32
    %c0_i32_0 = arith.constant 0 : i32
    %c0_i32_1 = arith.constant 0 : i32
    return %c0_i32, %c0_i32_0 : i32, i32
  }
  func.func @transform_3(%arg0: i32) -> (i32, i32) {
    %c0_i32 = arith.constant 0 : i32
    %c0_i32_0 = arith.constant 0 : i32
    %c0_i32_1 = arith.constant 0 : i32
    return %c0_i32, %c0_i32_0 : i32, i32
  }
  func.func @transform_4(%arg0: i32) -> (i32, i32) {
    %c0_i32 = arith.constant 0 : i32
    %c0_i32_0 = arith.constant 0 : i32
    %c0_i32_1 = arith.constant 0 : i32
    return %c0_i32, %c0_i32_0 : i32, i32
  }
  func.func @transform_5(%arg0: i32) -> (i32, i32) {
    %c0_i32 = arith.constant 0 : i32
    %c0_i32_0 = arith.constant 0 : i32
    return %arg0, %c0_i32 : i32, i32
  }
  func.func @transform_6(%arg0: i32) -> (i32, i32) {
    %c0_i32 = arith.constant 0 : i32
    %c0_i32_0 = arith.constant 0 : i32
    return %arg0, %c0_i32 : i32, i32
  }
}

</mosaic_0001>

<bundles_post_ra>
// kernel: tpu_custom_call.1
= control target key start
LH: loop header
LB: loop body
LE: loop exit
PB: predicated region body
PF: predicated region fallthrough
CT: control target
= control target key end

     0   :  { %11 = vsyncpa [#allocation3], 0  ;;  %s1329_s0 = inlined_call_operand.vmem [shape: f32[48,16], index: 0, kind: input, shape index: {}]   ;;  %s1330_s1 = inlined_call_operand.vmem [shape: f32[16,128], index: 1, kind: input, shape index: {}]   ;;  %s1331_s2 = inlined_call_operand.hbm [shape: f32[128,128], index: 2, kind: input, shape index: {}]   ;;  %s1332_s3 = inlined_call_operand.vmem [shape: f32[1,128], index: 3, kind: input, shape index: {}]   ;;  %s1333_s4 = inlined_call_operand.vmem [shape: f32[1,128], index: 4, kind: input, shape index: {}]   ;;  %s1334_s5 = inlined_call_operand.vmem [shape: f32[48,128], index: 5, kind: input, shape index: {}]   ;;  %s1335_s6 = inlined_call_operand.hbm [shape: f32[48,128], index: 6, kind: output, shape index: {}]  }
   0x1   :  { %12 = vsyncpa [#allocation4], 0 }
   0x2   :  { %14 = vsyncpa [#allocation4 + $0x1], 0  ;;  %s1105_s21 = smov 0   ;;  %s1107_s22 = smov 0  }
   0x3   :  { %s1109_s23 = smov 0   ;;  %s1111_s24 = smov 0  }
   0x4 LB: > { %s1126_s25 = sadd.s32 4294967295, %s1056_s24   ;;  %s797_s26 = sadd.s32 4294967294, %s1056_s24   ;;  %s1056_s24 = sphi %s1111_s24, %s1345_s24   ;;  %s1052_s23 = sphi %s1109_s23, %s1344_s23   ;;  %s1048_s22 = sphi %s1107_s22, %s1343_s22   ;;  %s1044_s21 = sphi %s1105_s21, %s1342_s21  }
   0x5   : > { %s1130_s27 = sadd.s32 1, %s1056_s24   ;;  %s163_s28 = sadd.s32 1, %s1052_s23 }
   0x6   : > { %s160_s29 = ssub.s32 %s1056_s24, %s1130_s27  ;;  %p173_p0 = scmp.ne.s32.totalorder %s1052_s23, %s1048_s22 }
   0x7   : > { %p161_p1 = scmp.eq.s32.totalorder %s160_s29, 0  ;;  %p174_p2 = scmp.eq.s32.totalorder %s1126_s25, 2 }
   0x8   : > { %p179_p3 = scmp.ne.s32.totalorder %s1048_s22, %s1044_s21  ;;  %p180_p4 = scmp.eq.s32.totalorder %s797_s26, 2 }
   0x9   : > { %s1141_s30 = scalar_select %p161_p1, %s1052_s23, %s163_s28  }
   0xa   : > { %p1143_p5 = por %p174_p2, %p173_p0  ;;  %p1147_p6 = por %p180_p4, %p179_p3 }
   0xb   : > { %p798_p7 = scmp.ge.s32.totalorder %s1056_s24, 1  ;;  %p187_p8 = scmp.lt.s32.totalorder %s1056_s24, 4 }
   0xc   : > { %s1337_s8 = scalar_select %p1147_p6, 1, 0 }
   0xd   : > { %p912_p9 = scmp.eq.s32.totalorder %s1126_s25, 0  ;;  %p1154_p10 = pnand %p798_p7, %p187_p8 }
   0xe   : > { %s1058_s10 = smov [#allocation2]  }
   0xf   : > { %s202_s11 = sshll.u32 %s1058_s10, 4  ;;  %p904_p11 = pneg %p1154_p10  ;;  %s203_s11 = int_to_ptr.vmem [resolvable:$true] %s202_s11 }
  0x10   : > { %s977_s12 = scalar_lea.vmem %s203_s11, 2048  ;;  %p985_p3 = scmp.lt.s32.totalorder %s203_s11, %s203_s11 }
  0x11   : > { %p905_p12 = pnand %p912_p9, %p904_p11  ;;  %p978_p0 = scmp.ne.s32.totalorder %s203_s11, %s977_s12 }
  0x12   : > { %p986_p4 = scmp.lt.s32.totalorder %s977_s12, %s977_s12 }
  0x13   : > { %p968_p13 = pneg %p905_p12 }
  0x14   : > { %p987_p6 = por %p986_p4, %p985_p3 }
  0x15   : > { %p980_p1 = pnand %p978_p0, %p968_p13 }
  0x17   : > { %p981_p2 = pneg %p980_p1 }
  0x19   : > { %p988_p7 = pnand %p987_p6, %p981_p2 }
  0x1b   : > { %991 = shalt.err (!%p988_p7)
}
  0x1c   : > { %s1059_s13 = smov 128   ;;  %s1060_s14 = smov 8  }
  0x1d   : > { %907 = dma.hbm_to_vmem [thread:$0]  (!%p905_p12), %s1331_s2, 2048, %s203_s11, [#allocation3], %s1059_s13, %s1059_s13, %s1060_s14  }
  0x1e   : > { %242 = sbr.rel (%p1154_p10) target bundleno = 549 (0x225), region = 44 }
  0x23   : > { %1035 = dma.done.wait (%p912_p9), [#allocation3], 2048  }
  0x24   : > { %1037 = vsyncadd (%p912_p9), [#allocation3], 4294965248  ;;  %s804_s17 = sshll.u32 %s1126_s25, 1  ;;  %vm320_vm0 = vcmask 130048   ;;  %v293_v0 = vld [vmem:[%s1330_s1 + $0x8] sm:$0xff]  ;;  %v292_v1 = vld [vmem:[%s1330_s1] sm:$0xff] }
  0x25   : > { %p278_p8 = scmp.lt.s32.totalorder %s804_s17, 5  ;;  %848 = vmatprep.subr.mxu0 %v293_v0  ;;  %v309_v4 = vld [vmem:[#allocation2 + $0x78] sm:$0xff]  ;;  %v308_v5 = vld [vmem:[#allocation2 + $0x70] sm:$0xff]  ;;  %v307_v6 = vld [vmem:[#allocation2 + $0x68] sm:$0xff]  ;;  %v1061_v42 = vmov 683565275  }
  0x26   : > { %849 = vmatpush3.msra.mxu0 %v293_v0  ;;  %855 = vmatprep.subr.mxu1 %v309_v4  ;;  %v306_v7 = vld [vmem:[#allocation2 + $0x60] sm:$0xff]  ;;  %v305_v8 = vld [vmem:[#allocation2 + $0x58] sm:$0xff]  ;;  %v304_v9 = vld [vmem:[#allocation2 + $0x50] sm:$0xff]  ;;  %v1062_v46 = vmov 2475754826   ;;  %s274_s13 = sand.u32 1, %s1048_s22  }
  0x27   : > { %s1347_s17 = smov (!%p278_p8, %s804_s17), 5  ;;  %850 = vmatprep.subr.mxu0 %v292_v1  ;;  %856 = vmatpush3.msra.mxu1 %v309_v4  ;;  %v303_v10 = vld [vmem:[#allocation2 + $0x48] sm:$0xff]  ;;  %v302_v11 = vld [vmem:[#allocation2 + $0x40] sm:$0xff]  ;;  %v301_v12 = vld [vmem:[#allocation2 + $0x38] sm:$0xff]  ;;  %v1063_v48 = vmov 2131351028  }
  0x28   : > { %s805_s18 = sshll.u32 %s1347_s17, 3  ;;  %851 = vmatpush3.msra.mxu0 %v292_v1  ;;  %857 = vmatprep.subr.mxu1 %v308_v5  ;;  %v300_v13 = vld [vmem:[#allocation2 + $0x30] sm:$0xff]  ;;  %v299_v14 = vld [vmem:[#allocation2 + $0x28] sm:$0xff]  ;;  %v298_v15 = vld [vmem:[#allocation2 + $0x20] sm:$0xff]  ;;  %v1064_v50 = vmov 2102212464  }
  0x29   : > { %s281_s26 = scalar_lea.vmem %s1329_s0, %s805_s18  ;;  %858 = vmatpush3.msra.mxu1 %v308_v5  ;;  %v297_v16 = vld [vmem:[#allocation2 + $0x18] sm:$0xff]  ;;  %v296_v17 = vld [vmem:[#allocation2 + $0x10] sm:$0xff]  ;;  %v295_v18 = vld [vmem:[#allocation2 + $0x8] sm:$0xff]  ;;  %v1065_v52 = vmov 920167782   ;;  %s287_s16 = scalar_lea.vmem %s1334_s5, %s805_s18 }
  0x2a   : > { %v290_v2 = vld [vmem:[%s281_s26] sm:$0xff]  ;;  %v291_v3 = vld [vmem:[%s281_s26 + $0x8] sm:$0xff]  ;;  %859 = vmatprep.subr.mxu1 %v307_v6  ;;  %v1066_v59 = vmov 1326507024   ;;  %s803_s19 = sshll.u32 %s274_s13, 4  ;;  %s825_s17 = sshll.u32 %s1126_s25, 8 }
  0x2b   : > { %852 = vmatprep.mubr.msk.f32.mxu0 %vm320_vm0, %v290_v2  ;;  %860 = vmatpush3.msra.mxu1 %v307_v6  ;;  %v294_v19 = vld [vmem:[#allocation2] sm:$0xff]  ;;  %s276_s28 = scalar_lea.vmem [#allocation5], %s803_s19  ;;  %s1287_s10 = scalar_lea.hbm %s1335_s6, %s825_s17 }
  0x2c   : > { %853 = vmatmul.mubr.msk.f32.vlgmr.msra.gmra.mxu0 %vm320_vm0, %v291_v3  ;;  %861 = vmatprep.subr.mxu1 %v306_v7  ;;  %v808_v20 = vld [vmem:[%s1332_s3] ss:$0 sm:$0xff]  ;;  %s711_s29 = sshll.u32 %s276_s28, 4  ;;  %s1289_s11 = scalar_lea.sflag [#allocation4], %s274_s13  ;;  %s1282_s29 = int_to_ptr.vmem [resolvable:$true] %s711_s29 }
  0x2d   : > { %862 = vmatpush3.msra.mxu1 %v306_v7  ;;  %s992_s12 = scalar_lea.vmem %s1282_s29, 256  ;;  %s1067_s25 = smov [#allocation5]  }
  0x2e   : > { %863 = vmatprep.subr.mxu1 %v305_v8  ;;  %p993_p6 = scmp.ne.s32.totalorder %s1282_s29, %s992_s12  ;;  %s996_s14 = sshll.u32 %s1067_s25, 4  ;;  %s997_s14 = int_to_ptr.vmem [resolvable:$false] %s996_s14 }
  0x2f   : > { %864 = vmatpush3.msra.mxu1 %v305_v8  ;;  %s998_s15 = scalar_lea.vmem %s997_s14, 512  ;;  %p999_p11 = scmp.lt.s32.totalorder %s1282_s29, %s997_s14 }
  0x30   : > { %865 = vmatprep.subr.mxu1 %v304_v9  ;;  %p994_p9 = pnand %p993_p6, %p1143_p5  ;;  %p1000_p12 = scmp.lt.s32.totalorder %s998_s15, %s992_s12 }
  0x31   : > { %866 = vmatpush3.msra.mxu1 %v304_v9 }
  0x32   : > { %867 = vmatprep.subr.mxu1 %v303_v10  ;;  %p995_p10 = pneg %p994_p9  ;;  %p1001_p13 = por %p1000_p12, %p999_p11 }
  0x33   : > { %868 = vmatpush3.msra.mxu1 %v303_v10 }
  0x34   : > { %869 = vmatprep.subr.mxu1 %v302_v11  ;;  %p1002_p0 = pnand %p1001_p13, %p995_p10 }
  0x35   : > { %870 = vmatpush3.msra.mxu1 %v302_v11 }
  0x36   : > { %871 = vmatprep.subr.mxu1 %v301_v12 }
  0x37   : > { %872 = vmatpush3.msra.mxu1 %v301_v12 }
  0x38   : > { %873 = vmatprep.subr.mxu1 %v300_v13 }
  0x39   : > { %874 = vmatpush3.msra.mxu1 %v300_v13 }
  0x3a   : > { %875 = vmatprep.subr.mxu1 %v299_v14 }
  0x3b   : > { %876 = vmatpush3.msra.mxu1 %v299_v14 }
  0x3c   : > { %877 = vmatprep.subr.mxu1 %v298_v15 }
  0x3d   : > { %878 = vmatpush3.msra.mxu1 %v298_v15 }
  0x3e   : > { %879 = vmatprep.subr.mxu1 %v297_v16 }
  0x3f   : > { %880 = vmatpush3.msra.mxu1 %v297_v16 }
  0x40   : > { %881 = vmatprep.subr.mxu1 %v296_v17 }
  0x41   : > { %882 = vmatpush3.msra.mxu1 %v296_v17 }
  0x42   : > { %883 = vmatprep.subr.mxu1 %v295_v18 }
  0x43   : > { %884 = vmatpush3.msra.mxu1 %v295_v18 }
  0x44   : > { %885 = vmatprep.subr.mxu1 %v294_v19 }
  0x45   : > { %886 = vmatpush3.msra.mxu1 %v294_v19 }
  0xec   : > { %v854_v21 = vpop.f32.mrf.mxu0 }
  0xed   : > { %v1189_v22 = vadd.f32 %v854_v21, %v808_v20 }
  0xee   : > { %v393_v23 = vpop.f32.mrf.mxu0 }
  0xef   : > { %v506_v24 = vand.u32 2147483647, %v1189_v22  ;;  %v509_v25 = vand.u32 2139095040, %v1189_v22  ;;  %v1193_v26 = vadd.f32 %v808_v20, %v393_v23  ;;  %vm508_vm15 = vcmp.lt.s32.totalorder %v1189_v22, 0 }
  0xf1   : > { %v510_v27 = vshrl.u32 %v509_v25, 23  ;;  %v405_v28 = vand.u32 2139095040, %v1193_v26  ;;  %v513_v30 = vand.u32 8388607, %v506_v24  ;;  %v402_v34 = vand.u32 2147483647, %v1193_v26 }
  0xf2   : > { %vm1253_vm0 = vcmp.le.f32.partialorder %v506_v24, 0.7853982 }
  0xf3   : > { %v815_v29 = vadd.s32 4294967169, %v510_v27  ;;  %v406_v31 = vshrl.u32 %v405_v28, 23  ;;  %v514_v35 = vor.u32 8388608, %v513_v30  ;;  %v1201_v40 = vand.u32 8388607, %v402_v34 }
  0xf5   : > { %v516_v32 = vadd.s32 1, %v815_v29  ;;  %v811_v33 = vadd.s32 4294967169, %v406_v31  ;;  %v1204_v44 = vshll.u32 %v514_v35, 8  ;;  %v410_v29 = vor.u32 8388608, %v1201_v40 }
  0xf7   : > { %vm517_vm1 = vcmp.gt.s32.totalorder %v516_v32, 0  ;;  %v412_v36 = vadd.s32 1, %v811_v33 }
  0xf8   : > { %v518_v37 = vsel %vm517_vm1, %v516_v32, 0  ;;  %vm404_vm1 = vcmp.lt.s32.totalorder %v1193_v26, 0 }
  0xf9   : > { %v519_v38 = vshrl.u32 %v518_v37, 5  ;;  %v520_v39 = vand.u32 31, %v518_v37  ;;  %vm413_vm2 = vcmp.gt.s32.totalorder %v412_v36, 0 }
  0xfa   : > { %v414_v45 = vsel %vm413_vm2, %v412_v36, 0  ;;  %vm403_vm2 = vcmp.le.f32.partialorder %v402_v34, 0.7853982 }
  0xfb   : > { %v521_v41 = vsub.s32 32, %v520_v39  ;;  %v523_v43 = vshll.u32 %v1061_v42, %v520_v39  ;;  %v526_v47 = vshll.u32 %v1062_v46, %v520_v39  ;;  %v529_v49 = vshll.u32 %v1063_v48, %v520_v39 }
  0xfc   : > { %v532_v51 = vshll.u32 %v1064_v50, %v520_v39  ;;  %v535_v53 = vshll.u32 %v1065_v52, %v520_v39  ;;  %vm538_vm3 = vcmp.lt.s32.totalorder %v519_v38, 1  ;;  %vm539_vm4 = vcmp.lt.s32.totalorder %v519_v38, 2 }
  0xfd   : > { %v524_v54 = vshrl.u32 %v1062_v46, %v521_v41  ;;  %v527_v55 = vshrl.u32 %v1063_v48, %v521_v41  ;;  %v530_v56 = vshrl.u32 %v1064_v50, %v521_v41  ;;  %v522_v57 = vshrl.u32 %v1061_v42, %v521_v41 }
  0xfe   : > { %v533_v58 = vshrl.u32 %v1065_v52, %v521_v41  ;;  %v536_v60 = vshrl.u32 %v1066_v59, %v521_v41  ;;  %vm540_vm5 = vcmp.lt.s32.totalorder %v519_v38, 3  ;;  %vm541_vm6 = vcmp.lt.s32.totalorder %v519_v38, 4 }
  0xff   : > { %v525_v61 = vor.u32 %v524_v54, %v523_v43  ;;  %v528_v62 = vor.u32 %v527_v55, %v526_v47  ;;  %v531_v63 = vor.u32 %v530_v56, %v529_v49  ;;  %v416_v2 = vand.u32 31, %v414_v45 }
 0x100   : > { %v534_v0 = vor.u32 %v533_v58, %v532_v51  ;;  %v537_v1 = vor.u32 %v536_v60, %v535_v53  ;;  %v415_v14 = vshrl.u32 %v414_v45, 5  ;;  %v450_v53 = vshll.u32 %v410_v29, 8 }
 0x101   : > { %v542_v3 = vsel %vm538_vm3, %v522_v57, %v525_v61  ;;  %v543_v4 = vsel %vm541_vm6, %v531_v63, 2102212464  ;;  %v546_v5 = vsel %vm538_vm3, %v525_v61, %v528_v62  ;;  %v550_v6 = vsel %vm538_vm3, %v528_v62, %v531_v63 }
 0x102   : > { %v544_v7 = vsel %vm540_vm5, %v528_v62, %v543_v4  ;;  %v547_v8 = vsel %vm541_vm6, %v534_v0, 920167782  ;;  %v551_v9 = vsel %vm541_vm6, %v537_v1, 1326507024  ;;  %v417_v10 = vsub.s32 32, %v416_v2 }
 0x103   : > { %v545_v11 = vsel %vm539_vm4, %v542_v3, %v544_v7  ;;  %v548_v12 = vsel %vm540_vm5, %v531_v63, %v547_v8  ;;  %v552_v13 = vsel %vm540_vm5, %v534_v0, %v551_v9  ;;  %v428_v17 = vshll.u32 %v1064_v50, %v416_v2 }
 0x104   : > { %v549_v15 = vsel %vm539_vm4, %v546_v5, %v548_v12  ;;  %v553_v16 = vsel %vm539_vm4, %v550_v6, %v552_v13  ;;  %v429_v18 = vshrl.u32 %v1065_v52, %v417_v10  ;;  %v431_v25 = vshll.u32 %v1065_v52, %v416_v2 }
 0x105   : > { %v1214_v19 = vmul.u32.u64.low %v1204_v44, %v553_v16  ;;  %v1215_v20 = vmul.u32.u64.high %v1204_v44, %v553_v16, %v1214_v19  ;;  %v1218_v21 = vmul.u32.u64.low %v1204_v44, %v549_v15  ;;  %v1219_v23 = vmul.u32.u64.high %v1204_v44, %v549_v15, %v1218_v21 }
 0x106   : > { %v432_v27 = vshrl.u32 %v1066_v59, %v417_v10  ;;  %v430_v28 = vor.u32 %v429_v18, %v428_v17  ;;  %v419_v30 = vshll.u32 %v1061_v42, %v416_v2  ;;  %v420_v31 = vshrl.u32 %v1062_v46, %v417_v10 }
 0x107   : > { %v561_v32 = vmul.u32 %v1204_v44, %v545_v11  ;;  %v422_v35 = vshll.u32 %v1062_v46, %v416_v2  ;;  %v423_v36 = vshrl.u32 %v1063_v48, %v417_v10  ;;  %vm563_vm7 = vc.u32 %v1215_v20, %v1218_v21 }
 0x108   : > { %v433_v33 = vor.u32 %v432_v27, %v431_v25  ;;  %v564_v37 = vadd.s32 1, %v1219_v23  ;;  %vm437_vm8 = vcmp.lt.s32.totalorder %v415_v14, 4  ;;  %v421_v38 = vor.u32 %v420_v31, %v419_v30 }
 0x109   : > { %v424_v41 = vor.u32 %v423_v36, %v422_v35  ;;  %v425_v43 = vshll.u32 %v1063_v48, %v416_v2  ;;  %v426_v45 = vshrl.u32 %v1064_v50, %v417_v10  ;;  %v443_v47 = vsel %vm437_vm8, %v430_v28, 920167782 }
 0x10a   : > { %v447_v39 = vsel %vm437_vm8, %v433_v33, 1326507024  ;;  %v565_v40 = vsel %vm563_vm7, %v564_v37, %v1219_v23  ;;  %vm434_vm9 = vcmp.lt.s32.totalorder %v415_v14, 1  ;;  %vm436_vm10 = vcmp.lt.s32.totalorder %v415_v14, 3 }
 0x10b   : > { %v566_v44 = vadd.s32 %v565_v40, %v561_v32  ;;  %v427_v46 = vor.u32 %v426_v45, %v425_v43  ;;  %v442_v49 = vsel %vm434_vm9, %v421_v38, %v424_v41  ;;  %v448_v51 = vsel %vm436_vm10, %v430_v28, %v447_v39 }
 0x10c   : > { %v418_v52 = vshrl.u32 %v1061_v42, %v417_v10  ;;  %vm435_vm11 = vcmp.lt.s32.totalorder %v415_v14, 2  ;;  %v562_v15 = vadd.s32 %v1218_v21, %v1215_v20 }
 0x10d   : > { %v567_v54 = vadd.s32 536870912, %v566_v44  ;;  %v439_v55 = vsel %vm437_vm8, %v427_v46, 2102212464  ;;  %v444_v48 = vsel %vm436_vm10, %v427_v46, %v443_v47  ;;  %v446_v50 = vsel %vm434_vm9, %v424_v41, %v427_v46 }
 0x10e   : > { %v438_v56 = vsel %vm434_vm9, %v418_v52, %v421_v38  ;;  %v445_v57 = vsel %vm435_vm11, %v442_v49, %v444_v48  ;;  %v449_v58 = vsel %vm435_vm11, %v446_v50, %v448_v51  ;;  %v440_v60 = vsel %vm436_vm10, %v424_v41, %v439_v55 }
 0x10f   : > { %v1233_v59 = vshrl.u32 %v567_v54, 30  ;;  %v1236_v61 = vmul.u32.u64.low %v450_v53, %v449_v58  ;;  %v1237_v62 = vmul.u32.u64.high %v450_v53, %v449_v58, %v1236_v61  ;;  %v441_v1 = vsel %vm435_vm11, %v438_v56, %v440_v60 }
 0x110   : > { %v1239_v63 = vmul.u32.u64.low %v450_v53, %v445_v57  ;;  %v1240_v42 = vmul.u32.u64.high %v450_v53, %v445_v57, %v1239_v63  ;;  %v457_v5 = vmul.u32 %v450_v53, %v441_v1  ;;  %vm494_vm9 = vweird.f32 %v1193_v26 }
 0x111   : > { %v569_v0 = vshll.u32 %v1233_v59, 30  ;;  %v592_v48 = vsub.s32 4, %v1233_v59  ;;  %vm598_vm10 = vweird.f32 %v1189_v22 }
 0x112   : > { %vm459_vm12 = vc.u32 %v1237_v62, %v1239_v63  ;;  %v460_v3 = vadd.s32 1, %v1240_v42  ;;  %v458_v20 = vadd.s32 %v1239_v63, %v1237_v62 }
 0x113   : > { %v570_v2 = vsub.s32 %v566_v44, %v569_v0  ;;  %v593_v58 = vsel %vm508_vm15, %v592_v48, %v1233_v59 }
 0x114   : > { %v461_v6 = vsel %vm459_vm12, %v460_v3, %v1240_v42  ;;  %v595_v61 = vsel %vm1253_vm0, 0, %v593_v58 }
 0x115   : > { %v572_v4 = vsub.s32 0, %v570_v2  ;;  %v462_v8 = vadd.s32 %v461_v6, %v457_v5  ;;  %v599_v63 = vadd.s32 3, %v595_v61 }
 0x117   : > { %v816_v7 = vmin.u32 %v572_v4, %v570_v2  ;;  %v463_v10 = vadd.s32 536870912, %v462_v8 }
 0x119   : > { %v574_v9 = vclz %v816_v7  ;;  %v464_v12 = vshrl.u32 %v463_v10, 30 }
 0x11b   : > { %v817_v11 = vadd.s32 4294967294, %v574_v9  ;;  %v465_v13 = vshll.u32 %v464_v12, 30  ;;  %v488_v56 = vsub.s32 4, %v464_v12 }
 0x11d   : > { %vm818_vm13 = vcmp.lt.s32.totalorder %v817_v11, 0  ;;  %v466_v18 = vsub.s32 %v462_v8, %v465_v13  ;;  %v489_v60 = vsel %vm404_vm1, %v488_v56, %v464_v12 }
 0x11e   : > { %v577_v14 = vsel %vm818_vm13, 0, %v817_v11  ;;  %v491_v62 = vsel %vm403_vm2, 0, %v489_v60 }
 0x11f   : > { %v578_v16 = vsub.s32 32, %v577_v14  ;;  %v582_v17 = vsub.s32 4294967266, %v577_v14  ;;  %v579_v19 = vshll.u32 %v570_v2, %v577_v14  ;;  %v468_v27 = vsub.s32 0, %v466_v18 }
 0x120   : > { %v495_v1 = vadd.s32 3, %v491_v62  ;;  %v600_v2 = vand.u32 3, %v599_v63 }
 0x121   : > { %v580_v23 = vshrl.u32 %v562_v15, %v578_v16  ;;  %v583_v25 = vadd.s32 127, %v582_v17  ;;  %v812_v30 = vmin.u32 %v468_v27, %v466_v18  ;;  %v819_v16 = vld [vmem:[%s1333_s4] ss:$0 sm:$0xff] }
 0x122   : > { %v496_v4 = vand.u32 3, %v495_v1  ;;  %vm602_vm3 = vcmp.eq.s32.totalorder %v600_v2, 0  ;;  %vm605_vm4 = vcmp.eq.s32.totalorder %v600_v2, 2  ;;  %vm601_vm7 = vcmp.lt.s32.totalorder %v600_v2, 2 }
 0x123   : > { %v581_v28 = vor.u32 %v580_v23, %v579_v19  ;;  %v584_v29 = vshll.u32 %v583_v25, 23  ;;  %v470_v32 = vclz %v812_v30  ;;  %v312_v19 = vld [vmem:[%s287_s16] sm:$0xff] }
 0x124   : > { %vm501_vm5 = vcmp.eq.s32.totalorder %v496_v4, 2  ;;  %vm498_vm6 = vcmp.eq.s32.totalorder %v496_v4, 0  ;;  %vm497_vm8 = vcmp.lt.s32.totalorder %v496_v4, 2 }
 0x125   : > { %v585_v31 = vor.u32 4788187, %v584_v29  ;;  %v588_v35 = vcvt.s32.f32 %v581_v28  ;;  %v813_v36 = vadd.s32 4294967294, %v470_v32 }
 0x127   : > { %v586_v33 = vand.u32 2147483647, %v585_v31  ;;  %vm814_vm14 = vcmp.lt.s32.totalorder %v813_v36, 0 }
 0x128   : > { %v473_v38 = vsel %vm814_vm14, 0, %v813_v36 }
 0x129   : > { %v589_v37 = vmul.f32 %v588_v35, %v586_v33  ;;  %v474_v21 = vsub.s32 32, %v473_v38  ;;  %v478_v41 = vsub.s32 4294967266, %v473_v38  ;;  %v475_v43 = vshll.u32 %v466_v18, %v473_v38 }
 0x12b   : > { %v590_v39 = vxor.u32 2147483648, %v589_v37  ;;  %v476_v45 = vshrl.u32 %v458_v20, %v474_v21  ;;  %v479_v40 = vadd.s32 127, %v478_v41 }
 0x12d   : > { %v591_v47 = vsel %vm508_vm15, %v590_v39, %v589_v37  ;;  %v477_v44 = vor.u32 %v476_v45, %v475_v43  ;;  %v480_v46 = vshll.u32 %v479_v40, 23 }
 0x12e   : > { %v594_v52 = vsel %vm1253_vm0, %v1189_v22, %v591_v47 }
 0x12f   : > { %v481_v51 = vor.u32 4788187, %v480_v46  ;;  %v484_v54 = vcvt.s32.f32 %v477_v44  ;;  %958 = vcosq.f32 %v594_v52 }
 0x130   : > { %960 = vsinq.f32 %v594_v52 }
 0x131   : > { %v482_v53 = vand.u32 2147483647, %v481_v51 }
 0x133   : > { %v485_v55 = vmul.f32 %v484_v54, %v482_v53 }
 0x135   : > { %v486_v50 = vxor.u32 2147483648, %v485_v55 }
 0x137   : > { %v487_v24 = vsel %vm404_vm1, %v486_v50, %v485_v55 }
 0x138   : > { %v490_v57 = vsel %vm403_vm2, %v1193_v26, %v487_v24  ;;  %v313_v26 = vld [vmem:[%s287_s16 + $0x8] sm:$0xff] }
 0x139   : > { %962 = vcosq.f32 %v490_v57 }
 0x13a   : > { %964 = vsinq.f32 %v490_v57 }
 0x13c   : > { %v959_v42 = vpop.eup %958 }
 0x13d   : > { %v961_v0 = vpop.eup %960  ;;  %v606_v3 = vxor.u32 2147483648, %v959_v42 }
 0x13e   : > { %v603_v34 = vxor.u32 2147483648, %v961_v0 }
 0x13f   : > { %v607_v8 = vsel %vm605_vm4, %v606_v3, %v961_v0 }
 0x140   : > { %v604_v7 = vsel %vm602_vm3, %v959_v42, %v603_v34 }
 0x141   : > { %v608_v12 = vsel %vm601_vm7, %v604_v7, %v607_v8 }
 0x142   : > { %v609_v15 = vsel %vm598_vm10, nan, %v608_v12 }
 0x146   : > { %v963_v5 = vpop.eup %962 }
 0x147   : > { %v965_v6 = vpop.eup %964  ;;  %v502_v59 = vxor.u32 2147483648, %v963_v5 }
 0x148   : > { %v499_v9 = vxor.u32 2147483648, %v965_v6 }
 0x149   : > { %v503_v10 = vsel %vm501_vm5, %v502_v59, %v965_v6 }
 0x14a   : > { %v500_v11 = vsel %vm498_vm6, %v963_v5, %v499_v9 }
 0x14b   : > { %v504_v13 = vsel %vm497_vm8, %v500_v11, %v503_v10 }
 0x14c   : > { %v505_v14 = vsel %vm494_vm9, nan, %v504_v13 }
 0x14d   : > { %887 = vmatprep.mubr.f32.mxu1 %v505_v14 }
 0x14e   : > { %888 = vmatmul.mubr.f32.vlgmr.msra.gmra.mxu1 %v609_v15 }
 0x20e   : > { %v889_v17 = vpop.f32.mrf.mxu1 }
 0x20f   : > { %v688_v18 = vadd.f32 %v889_v17, %v819_v16 }
 0x210   : > { %v682_v22 = vpop.f32.mrf.mxu1 }
 0x211   : > { %v692_v23 = vadd.f32 %v688_v18, %v313_v26  ;;  %v683_v25 = vadd.f32 %v819_v16, %v682_v22 }
 0x213   : > { %v694_v27 = vmax.f32 %v692_v23, 0.0  ;;  %v691_v28 = vadd.f32 %v683_v25, %v312_v19 }
 0x215   : > { %696 = vst [vmem:[%s276_s28 + $0x8] sm:$0xff] %v694_v27  ;;  %v693_v29 = vmax.f32 %v691_v28, 0.0 }
 0x217   : > { %695 = vst [vmem:[%s276_s28] sm:$0xff] %v693_v29 }
 0x218   : > { %1005 = shalt.err (!%p1002_p0)
}
 0x219   : > { %s1006_s13 = scalar_lea.hbm %s1287_s10, 256  ;;  %s1010_s20 = scalar_lea.hbm %s1335_s6, 768 }
 0x21a   : > { %p1007_p1 = scmp.ne.s32.totalorder %s1287_s10, %s1006_s13  ;;  %p1011_p4 = scmp.lt.s32.totalorder %s1287_s10, %s1335_s6 }
 0x21b   : > { %p1012_p7 = scmp.lt.s32.totalorder %s1010_s20, %s1006_s13 }
 0x21c   : > { %p1008_p2 = pnand %p1007_p1, %p1143_p5 }
 0x21d   : > { %p1013_p8 = por %p1012_p7, %p1011_p4 }
 0x21e   : > { %p1009_p3 = pneg %p1008_p2 }
 0x220   : > { %p1014_p6 = pnand %p1013_p8, %p1009_p3 }
 0x222   : > { %1017 = shalt.err (!%p1014_p6)
}
 0x223   : > { %s1068_s17 = smov 128   ;;  %s1069_s18 = smov 8  }
 0x224   : > { %902 = dma.vmem_to_hbm [thread:$0]  (%p1143_p5), %s1282_s29, 256, %s1287_s10, %s1289_s11, %s1068_s17, %s1068_s17, %s1069_s18  }
 0x225 PF: > { %p914_p9 = scmp.ge.s32.totalorder %s1056_s24, 2  ;;  %s726_s9 = sand.u32 1, %s1044_s21  }
 0x226   : > { %p1341_p10 = scmp.ne.s32.totalorder %s1337_s8, 0  ;;  %s727_s12 = scalar_lea.sflag [#allocation4], %s726_s9 }
 0x228   : > { %p909_p11 = pnand %p914_p9, %p1341_p10 }
 0x22a   : > { %p910_p12 = pneg %p909_p11 }
 0x22c   : > { %1039 = dma.done.wait (%p910_p12), %s727_s12, 256  }
 0x22d   : > { %1041 = vsyncadd (%p910_p12), %s727_s12, 4294967040  ;;  %p17_p13 = scmp.ge.s32.totalorder %s1130_s27, 5   ;;  %s1342_s21 = smov %s1048_s22 }
 0x22e   : > { %s1343_s22 = smov %s1052_s23  ;;  %s1344_s23 = smov %s1141_s30 }
 0x22f   : > { %s1345_s24 = smov %s1130_s27  ;;  %19 = sbr.rel (!%p17_p13) target bundleno = 4 (0x4), region = 87 }
 0x234   :  { %732 = vsyncpa [#allocation3], 1 }
 0x235   :  { %734 = vsyncpa [#allocation3 + $0x1], 1 }
 0x236   :  { %735 = vsyncpa [#allocation4], 1 }
 0x237   :  { %737 = vsyncpa [#allocation4 + $0x1], 1 }

</bundles_post_ra>
